<compile_context>
chip_gen: v7x
topology: tpu7x:2x2x1
jax: 0.10.0
libtpu: 0.0.40
codegen_flags: <defaults>
</compile_context>

<pallas_src>
import jax
import jax.numpy as jnp
import numpy as np
from jax.experimental import pallas as pl
from jax.experimental.pallas import tpu as pltpu


# --------------------------------------------------------------------------
# Kernel: one (batch, token-tile) per grid step.
# --------------------------------------------------------------------------
def _final_layer_kernel(x_ref, c_ref, w_ada_ref, b_ada_ref,
                        w_lin_ref, b_lin_ref, o_ref):
    x = x_ref[...]                       # [tT, H] f32
    c = c_ref[...]                       # [1, H]  f32
    H = x.shape[-1]

    # ---- adaLN modulation: Linear(SiLU(c)) -> (shift, scale) --------------
    cs = c * jax.nn.sigmoid(c)                                   # SiLU (f32)
    ada = jnp.dot(cs.astype(jnp.bfloat16), w_ada_ref[...],
                  preferred_element_type=jnp.float32) + b_ada_ref[...]
    shift = ada[:, :H]                                           # [1, H]
    scale = ada[:, H:]                                           # [1, H]

    # ---- LayerNorm (no affine, eps=1e-6) + modulate -------------------------
    mu = jnp.mean(x, axis=-1, keepdims=True)
    var = jnp.mean((x - mu) ** 2, axis=-1, keepdims=True)
    xn = (x - mu) * jax.lax.rsqrt(var + 1e-6)
    mod = xn * (1.0 + scale) + shift                             # [tT, H]

    # ---- Final projection ----------------------------------------------------
    out = jnp.dot(mod.astype(jnp.bfloat16), w_lin_ref[...],
                  preferred_element_type=jnp.float32) + b_lin_ref[...]
    o_ref[...] = out.astype(o_ref.dtype)


# --------------------------------------------------------------------------
# Wrapper
# --------------------------------------------------------------------------
def _vmem_limit_bytes():
    # Generation-aware scoped VMEM limit: ~3/4 of physical, capped at 96 MiB.
    try:
        cap = pltpu.get_tpu_info().vmem_capacity_bytes
    except Exception:
        cap = 64 * 1024 * 1024
    return int(min(cap * 3 // 4, 96 * 1024 * 1024))


def final_layer(x, c, params, *, block_t=256):
    B, T, H = x.shape
    out_dim = params["w_lin"].shape[1]
    bt = T if T <= block_t else block_t        # token tile (multiple of 8 or full T)
    grid = (B, pl.cdiv(T, bt))

    c3 = c.reshape(B, 1, H)
    # Cast MXU weights to bf16 at the boundary; biases stay f32.
    w_ada = params["w_ada"].astype(jnp.bfloat16)
    w_lin = params["w_lin"].astype(jnp.bfloat16)

    in_specs = [
        pl.BlockSpec((pl.Squeezed(), bt, H), lambda b, t: (b, t, 0)),    # x
        pl.BlockSpec((pl.Squeezed(), 1, H), lambda b, t: (b, 0, 0)),     # c
        pl.BlockSpec((H, 2 * H), lambda b, t: (0, 0)),                   # W_ada
        pl.BlockSpec((1, 2 * H), lambda b, t: (0, 0)),                   # b_ada
        pl.BlockSpec((H, out_dim), lambda b, t: (0, 0)),                 # W_lin
        pl.BlockSpec((1, out_dim), lambda b, t: (0, 0)),                 # b_lin
    ]
    out_spec = pl.BlockSpec((pl.Squeezed(), bt, out_dim),
                            lambda b, t: (b, t, 0))

    return pl.pallas_call(
        _final_layer_kernel,
        out_shape=jax.ShapeDtypeStruct((B, T, out_dim), x.dtype),
        grid=grid,
        in_specs=in_specs,
        out_specs=out_spec,
        compiler_params=pltpu.CompilerParams(
            dimension_semantics=("parallel", "parallel"),
            vmem_limit_bytes=_vmem_limit_bytes()),
    )(x, c3, w_ada, params["b_ada"], w_lin, params["b_lin"])


# --------------------------------------------------------------------------
# Pure-JAX reference (mirrors the PyTorch forward pass, all f32)
# --------------------------------------------------------------------------
def final_layer_ref(x, c, params):
    cs = c * jax.nn.sigmoid(c)
    ada = cs @ params["w_ada"] + params["b_ada"][0]
    shift, scale = jnp.split(ada, 2, axis=1)
    mu = jnp.mean(x, -1, keepdims=True)
    var = jnp.mean((x - mu) ** 2, -1, keepdims=True)
    xn = (x - mu) / jnp.sqrt(var + 1e-6)
    mod = xn * (1.0 + scale[:, None, :]) + shift[:, None, :]
    return mod @ params["w_lin"] + params["b_lin"][0]


# --------------------------------------------------------------------------
if __name__ == "__main__":
    B, T, H = 2, 8, 32
    patch_size, out_channels = 2, 4
    out_dim = patch_size * patch_size * out_channels   # 16

    key = jax.random.PRNGKey(0)
    keys = jax.random.split(key, 8)
    f = jnp.float32
    params = dict(
        w_ada=jax.random.normal(keys[0], (H, 2 * H), f) * 0.02,   # [in, out]
        b_ada=jax.random.normal(keys[1], (1, 2 * H), f) * 0.02,
        w_lin=jax.random.normal(keys[2], (H, out_dim), f) * 0.02,
        b_lin=jax.random.normal(keys[3], (1, out_dim), f) * 0.02,
    )
    x = jax.random.normal(keys[4], (B, T, H), f)
    c = jax.random.normal(keys[5], (B, H), f)

    out = final_layer(x, c, params)
    out = jax.block_until_ready(out)

    ref = final_layer_ref(x, c, params)
    assert out.shape == (B, T, out_dim)
    np.testing.assert_allclose(np.asarray(out), np.asarray(ref),
                               rtol=2e-2, atol=2e-2)
    print("KERNEL_OK")
</pallas_src>

<mosaic_0001>
module attributes {stable_mosaic.version = 11 : i64} {
  func.func @_final_layer_kernel(%arg0: i32, %arg1: i32, %arg2: memref<1x8x32xf32, #tpu.memory_space<vmem>>, %arg3: memref<1x1x32xf32, #tpu.memory_space<vmem>>, %arg4: memref<32x64xbf16, #tpu.memory_space<vmem>>, %arg5: memref<1x64xf32, #tpu.memory_space<vmem>>, %arg6: memref<32x16xbf16, #tpu.memory_space<vmem>>, %arg7: memref<1x16xf32, #tpu.memory_space<vmem>>, %arg8: memref<1x8x16xf32, #tpu.memory_space<vmem>>) attributes {dimension_semantics = [#tpu.dimension_semantics<parallel>, #tpu.dimension_semantics<parallel>], iteration_bounds = array<i64: 2, 1>, scalar_prefetch = 0 : i64, scratch_operands = 0 : i64, tpu.core_type = #tpu.core_type<tc>, window_params = [{transform_indices = @transform_0, window_bounds = array<i64: 1, 8, 32>}, {transform_indices = @transform_1, window_bounds = array<i64: 1, 1, 32>}, {pipeline_mode = #tpu.pipeline_mode<synchronous>, transform_indices = @transform_2, window_bounds = array<i64: 32, 64>}, {pipeline_mode = #tpu.pipeline_mode<synchronous>, transform_indices = @transform_3, window_bounds = array<i64: 1, 64>}, {pipeline_mode = #tpu.pipeline_mode<synchronous>, transform_indices = @transform_4, window_bounds = array<i64: 32, 16>}, {pipeline_mode = #tpu.pipeline_mode<synchronous>, transform_indices = @transform_5, window_bounds = array<i64: 1, 16>}, {transform_indices = @transform_6, window_bounds = array<i64: 1, 8, 16>}]} {
    %c0 = arith.constant 0 : index
    %c0_0 = arith.constant 0 : index
    %c0_1 = arith.constant 0 : index
    %0 = vector.load %arg2[%c0, %c0_0, %c0_1] : memref<1x8x32xf32, #tpu.memory_space<vmem>>, vector<1x8x32xf32>
    %1 = vector.shape_cast %0 : vector<1x8x32xf32> to vector<8x32xf32>
    %c0_2 = arith.constant 0 : index
    %c0_3 = arith.constant 0 : index
    %c0_4 = arith.constant 0 : index
    %2 = vector.load %arg3[%c0_2, %c0_3, %c0_4] : memref<1x1x32xf32, #tpu.memory_space<vmem>>, vector<1x1x32xf32>
    %3 = vector.shape_cast %2 : vector<1x1x32xf32> to vector<1x32xf32>
    %4 = arith.negf %3 : vector<1x32xf32>
    %5 = math.exp %4 : vector<1x32xf32>
    %cst = arith.constant 1.000000e+00 : f32
    %6 = vector.broadcast %cst : f32 to vector<1x32xf32>
    %7 = arith.addf %6, %5 : vector<1x32xf32>
    %8 = arith.divf %6, %7 : vector<1x32xf32>
    %9 = arith.mulf %3, %8 : vector<1x32xf32>
    %10 = arith.truncf %9 : vector<1x32xf32> to vector<1x32xbf16>
    %c0_5 = arith.constant 0 : index
    %c0_6 = arith.constant 0 : index
    %11 = vector.load %arg4[%c0_5, %c0_6] : memref<32x64xbf16, #tpu.memory_space<vmem>>, vector<32x64xbf16>
    %cst_7 = arith.constant dense<0.000000e+00> : vector<1x64xf32>
    %12 = tpu.matmul %10, %11, %cst_7 {dimension_numbers = #tpu.dot_dimension_numbers<[1], [0], [0], [1], [0, 0, 1, 1], [], []>} : vector<1x32xbf16>, vector<32x64xbf16>, vector<1x64xf32> -> vector<1x64xf32>
    %c0_8 = arith.constant 0 : index
    %c0_9 = arith.constant 0 : index
    %13 = vector.load %arg5[%c0_8, %c0_9] : memref<1x64xf32, #tpu.memory_space<vmem>>, vector<1x64xf32>
    %14 = arith.addf %12, %13 : vector<1x64xf32>
    %15 = vector.extract_strided_slice %14 {offsets = [0, 0], sizes = [1, 32], strides = [1, 1]} : vector<1x64xf32> to vector<1x32xf32>
    %16 = vector.extract_strided_slice %14 {offsets = [0, 32], sizes = [1, 32], strides = [1, 1]} : vector<1x64xf32> to vector<1x32xf32>
    %cst_10 = arith.constant dense<0.000000e+00> : vector<8xf32>
    %17 = vector.multi_reduction <add>, %1, %cst_10 [1] : vector<8x32xf32> to vector<8xf32>
    %18 = vector.shape_cast %17 : vector<8xf32> to vector<8x1xf32>
    %cst_11 = arith.constant 3.200000e+01 : f32
    %19 = vector.broadcast %cst_11 : f32 to vector<8x1xf32>
    %20 = arith.divf %18, %19 : vector<8x1xf32>
    %21 = vector.broadcast %20 : vector<8x1xf32> to vector<8x32xf32>
    %22 = arith.subf %1, %21 : vector<8x32xf32>
    %23 = arith.mulf %22, %22 : vector<8x32xf32>
    %cst_12 = arith.constant dense<0.000000e+00> : vector<8xf32>
    %24 = vector.multi_reduction <add>, %23, %cst_12 [1] : vector<8x32xf32> to vector<8xf32>
    %25 = vector.shape_cast %24 : vector<8xf32> to vector<8x1xf32>
    %cst_13 = arith.constant 3.200000e+01 : f32
    %26 = vector.broadcast %cst_13 : f32 to vector<8x1xf32>
    %27 = arith.divf %25, %26 : vector<8x1xf32>
    %28 = vector.broadcast %20 : vector<8x1xf32> to vector<8x32xf32>
    %29 = arith.subf %1, %28 : vector<8x32xf32>
    %cst_14 = arith.constant 9.99999997E-7 : f32
    %30 = vector.broadcast %cst_14 : f32 to vector<8x1xf32>
    %31 = arith.addf %27, %30 : vector<8x1xf32>
    %32 = math.rsqrt %31 : vector<8x1xf32>
    %33 = vector.broadcast %32 : vector<8x1xf32> to vector<8x32xf32>
    %34 = arith.mulf %29, %33 : vector<8x32xf32>
    %cst_15 = arith.constant 1.000000e+00 : f32
    %35 = vector.broadcast %cst_15 : f32 to vector<1x32xf32>
    %36 = arith.addf %35, %16 : vector<1x32xf32>
    %37 = vector.broadcast %36 : vector<1x32xf32> to vector<8x32xf32>
    %38 = arith.mulf %34, %37 : vector<8x32xf32>
    %39 = vector.broadcast %15 : vector<1x32xf32> to vector<8x32xf32>
    %40 = arith.addf %38, %39 : vector<8x32xf32>
    %41 = arith.truncf %40 : vector<8x32xf32> to vector<8x32xbf16>
    %c0_16 = arith.constant 0 : index
    %c0_17 = arith.constant 0 : index
    %42 = vector.load %arg6[%c0_16, %c0_17] : memref<32x16xbf16, #tpu.memory_space<vmem>>, vector<32x16xbf16>
    %cst_18 = arith.constant dense<0.000000e+00> : vector<8x16xf32>
    %43 = tpu.matmul %41, %42, %cst_18 {dimension_numbers = #tpu.dot_dimension_numbers<[1], [0], [0], [1], [0, 0, 1, 1], [], []>} : vector<8x32xbf16>, vector<32x16xbf16>, vector<8x16xf32> -> vector<8x16xf32>
    %c0_19 = arith.constant 0 : index
    %c0_20 = arith.constant 0 : index
    %44 = vector.load %arg7[%c0_19, %c0_20] : memref<1x16xf32, #tpu.memory_space<vmem>>, vector<1x16xf32>
    %45 = vector.broadcast %44 : vector<1x16xf32> to vector<8x16xf32>
    %46 = arith.addf %43, %45 : vector<8x16xf32>
    %c0_21 = arith.constant 0 : index
    %c0_22 = arith.constant 0 : index
    %c0_23 = arith.constant 0 : index
    %47 = vector.load %arg8[%c0_21, %c0_22, %c0_23] : memref<1x8x16xf32, #tpu.memory_space<vmem>>, vector<1x8x16xf32>
    %48 = vector.shape_cast %47 : vector<1x8x16xf32> to vector<8x16xf32>
    %49 = vector.shape_cast %46 : vector<8x16xf32> to vector<1x8x16xf32>
    tpu.vector_store %arg8[%c0_21, %c0_22, %c0_23], %49 {strides = array<i32>} : memref<1x8x16xf32, #tpu.memory_space<vmem>>, vector<1x8x16xf32>,
    return
  }
  func.func @transform_0(%arg0: i32, %arg1: i32) -> (i32, i32, i32) {
    %c0_i32 = arith.constant 0 : i32
    %c0_i32_0 = arith.constant 0 : i32
    return %arg0, %arg1, %c0_i32 : i32, i32, i32
  }
  func.func @transform_1(%arg0: i32, %arg1: i32) -> (i32, i32, i32) {
    %c0_i32 = arith.constant 0 : i32
    %c0_i32_0 = arith.constant 0 : i32
    %c0_i32_1 = arith.constant 0 : i32
    return %arg0, %c0_i32, %c0_i32_0 : i32, i32, i32
  }
  func.func @transform_2(%arg0: i32, %arg1: i32) -> (i32, i32) {
    %c0_i32 = arith.constant 0 : i32
    %c0_i32_0 = arith.constant 0 : i32
    %c0_i32_1 = arith.constant 0 : i32
    return %c0_i32, %c0_i32_0 : i32, i32
  }
  func.func @transform_3(%arg0: i32, %arg1: i32) -> (i32, i32) {
    %c0_i32 = arith.constant 0 : i32
    %c0_i32_0 = arith.constant 0 : i32
    %c0_i32_1 = arith.constant 0 : i32
    return %c0_i32, %c0_i32_0 : i32, i32
  }
  func.func @transform_4(%arg0: i32, %arg1: i32) -> (i32, i32) {
    %c0_i32 = arith.constant 0 : i32
    %c0_i32_0 = arith.constant 0 : i32
    %c0_i32_1 = arith.constant 0 : i32
    return %c0_i32, %c0_i32_0 : i32, i32
  }
  func.func @transform_5(%arg0: i32, %arg1: i32) -> (i32, i32) {
    %c0_i32 = arith.constant 0 : i32
    %c0_i32_0 = arith.constant 0 : i32
    %c0_i32_1 = arith.constant 0 : i32
    return %c0_i32, %c0_i32_0 : i32, i32
  }
  func.func @transform_6(%arg0: i32, %arg1: i32) -> (i32, i32, i32) {
    %c0_i32 = arith.constant 0 : i32
    %c0_i32_0 = arith.constant 0 : i32
    return %arg0, %arg1, %c0_i32 : i32, i32, i32
  }
}

</mosaic_0001>

<bundles_post_ra>
// kernel: tpu_custom_call.1
= control target key start
LH: loop header
LB: loop body
LE: loop exit
PB: predicated region body
PF: predicated region fallthrough
CT: control target
= control target key end

     0   :  { %11 = vsyncpa [#allocation3], 0  ;;  %s1025_s0 = inlined_call_operand.vmem [shape: f32[2,8,32], index: 0, kind: input, shape index: {}]   ;;  %s1026_s1 = inlined_call_operand.vmem [shape: f32[2,1,32], index: 1, kind: input, shape index: {}]   ;;  %s1027_s2 = inlined_call_operand.hbm [shape: bf16[32,64], index: 2, kind: input, shape index: {}]   ;;  %s1028_s3 = inlined_call_operand.vmem [shape: f32[1,64], index: 3, kind: input, shape index: {}]   ;;  %s1029_s4 = inlined_call_operand.vmem [shape: bf16[32,16], index: 4, kind: input, shape index: {}]   ;;  %s1030_s5 = inlined_call_operand.vmem [shape: f32[1,16], index: 5, kind: input, shape index: {}]   ;;  %s1031_s6 = inlined_call_operand.hbm [shape: f32[2,8,16], index: 6, kind: output, shape index: {}]  }
   0x1   :  { %12 = vsyncpa [#allocation4], 0 }
   0x2   :  { %14 = vsyncpa [#allocation4 + $0x1], 0  ;;  %s856_s21 = smov 0   ;;  %s858_s22 = smov 0  }
   0x3   :  { %s860_s23 = smov 0   ;;  %s862_s24 = smov 0  }
   0x4   :  { %s864_s25 = smov 0   ;;  %s866_s26 = smov 0  }
   0x5 LB: > { %s578_s27 = sadd.s32 4294967295, %s812_s26   ;;  %s579_s28 = sadd.s32 4294967294, %s812_s26   ;;  %s812_s26 = sphi %s866_s26, %s20_s26   ;;  %s808_s25 = sphi %s864_s25, %s1049_s25   ;;  %s804_s24 = sphi %s862_s24, %s1048_s24   ;;  %s800_s23 = sphi %s860_s23, %s1047_s23   ;;  %s796_s22 = sphi %s858_s22, %s1046_s22   ;;  %s792_s21 = sphi %s856_s21, %s1045_s21  }
   0x6   : > { %s32_s29 = sadd.s32 1, %s808_s25  ;;  %s179_s30 = sadd.s32 1, %s800_s23 }
   0x7   : > { %p34_p0 = scmp.ge.s32.totalorder %s32_s29, 2  ;;  %p189_p1 = scmp.ne.s32.totalorder %s800_s23, %s796_s22 }
   0x8   : > { %p190_p2 = scmp.eq.s32.totalorder %s578_s27, 1  ;;  %p195_p3 = scmp.ne.s32.totalorder %s796_s22, %s792_s21 }
   0x9   : > { %s1051_s29 = smov (%p34_p0, %s32_s29), 0  ;;  %p196_p5 = scmp.eq.s32.totalorder %s579_s28, 1 }
   0xa   : > { %p896_p4 = por %p190_p2, %p189_p1  ;;  %s174_s8 = ssub.s32 %s808_s25, %s1051_s29 }
   0xb   : > { %p580_p6 = scmp.ge.s32.totalorder %s812_s26, 1  ;;  %p177_p7 = scmp.eq.s32.totalorder %s174_s8, 0 }
   0xc   : > { %s1036_s7 = scalar_select %p896_p4, 1, 0 }
   0xd   : > { %p903_p8 = por %p196_p5, %p195_p3  ;;  %p203_p9 = scmp.lt.s32.totalorder %s812_s26, 3 }
   0xe   : > { %s909_s10 = scalar_select %p177_p7, %s800_s23, %s179_s30  }
   0xf   : > { %s1037_s9 = scalar_select %p903_p8, 1, 0 }
  0x10   : > { %p911_p10 = pnand %p580_p6, %p203_p9  ;;  %p915_p11 = scmp.eq.s32.totalorder %s578_s27, 0 }
  0x11   : > { %s814_s13 = smov [#allocation2]   ;;  %s702_s18 = scalar_lea.hbm %s1027_s2, 256 }
  0x12   : > { %s1038_s11 = scalar_select %p911_p10, 1, 0 }
  0x13   : > { %s1039_s12 = scalar_select %p915_p11, 1, 0 }
  0x14   : > { %p627_p12 = pneg %p911_p10  ;;  %s215_s14 = sshll.u32 %s814_s13, 4  ;;  %s216_s14 = int_to_ptr.vmem [resolvable:$true] %s215_s14 }
  0x15   : > { %p703_p0 = scmp.ne.s32.totalorder %s1027_s2, %s702_s18  ;;  %p709_p5 = scmp.lt.u32.totalorder %s702_s18, %s1027_s2 }
  0x16   : > { %p923_p13 = pnand %p915_p11, %p627_p12 }
  0x18   : > { %p704_p1 = pneg %p923_p13 }
  0x1a   : > { %p705_p2 = pnand %p704_p1, %p703_p0 }
  0x1c   : > { %p706_p3 = pneg %p705_p2 }
  0x1e   : > { %p711_p6 = pnand %p709_p5, %p706_p3 }
  0x20   : > { %714 = shalt.err (!%p711_p6)
}
  0x21   : > { %s715_s30 = scalar_lea.vmem %s216_s14, 256  ;;  %p723_p8 = scmp.lt.s32.totalorder %s216_s14, %s216_s14 }
  0x22   : > { %p716_p7 = scmp.ne.s32.totalorder %s216_s14, %s715_s30  ;;  %p724_p4 = scmp.lt.s32.totalorder %s715_s30, %s715_s30 }
  0x24   : > { %p718_p9 = pnand %p716_p7, %p704_p1  ;;  %p725_p11 = por %p724_p4, %p723_p8 }
  0x26   : > { %p719_p12 = pneg %p718_p9 }
  0x28   : > { %p726_p10 = pnand %p725_p11, %p719_p12 }
  0x2a   : > { %729 = shalt.err (!%p726_p10)
}
  0x2b   : > { %s815_s8 = smov 64   ;;  %s816_s13 = smov 4  }
  0x2c   : > { %630 = dma.hbm_to_vmem [thread:$0]  (!%p923_p13), %s1027_s2, 256, %s216_s14, [#allocation3], %s815_s8, %s815_s8, %s816_s13  }
  0x2d   : > { %p1041_p0 = scmp.ne.s32.totalorder %s1038_s11, 0 }
  0x2e   : > { %p1042_p2 = scmp.ne.s32.totalorder (!%p1041_p0), %s1039_s12, 0 }
  0x2f   : > { %256 = sbr.rel (%p1041_p0) target bundleno = 658 (0x292), region = 44 }
  0x36   : > { %783 = dma.done.wait (%p1042_p2), [#allocation3], 256  }
  0x37   : > { %785 = vsyncadd (%p1042_p2), [#allocation3], 4294967040  ;;  %p291_p4 = scmp.lt.s32.totalorder %s804_s24, 1  ;;  %v817_v0 = vmov 0.0   ;;  %vm818_vm0 = vmmov 0   ;;  %vm329_vm1 = vcmask 261120   ;;  %v388_v18 = vlaneseq }
  0x38   : > { %605 = vmatprep.subr.bf16.mxu0 %v817_v0  ;;  %609 = vmatprep.mubr.msk.bf16.mxu0 %vm818_vm0, %v817_v0  ;;  %v692_v5 = vld [vmem:[#allocation2] sm:$0xff]   ;;  %v693_v6 = vld [vmem:[#allocation2 + $0x8] sm:$0xff]   ;;  %s596_s20 = sshll.u32 %s804_s24, 7  ;;  %vm469_vm2 = vcmask 130048   ;;  %p1043_p10 = scmp.ne.s32.totalorder %s1036_s7, 0 }
  0x39   : > { %s292_s15 = scalar_select %p291_p4, %s804_s24, 1  ;;  %613 = vmatprep.subr.bf16.mxu1 %v817_v0  ;;  %617 = vmatprep.mubr.msk.bf16.mxu1 %vm818_vm0, %v817_v0  ;;  %v694_v17 = vld [vmem:[%s1029_s4] sm:$0xff]   ;;  %v389_v19 = vshrl.u32 %v388_v18, 7  ;;  %v695_v20 = vld [vmem:[%s1029_s4 + $0x8] sm:$0xff]  }
  0x3a   : > { %606 = vmatpush3.bf16.msra.mxu0 %v692_v5  ;;  %614 = vmatpush3.bf16.msra.mxu1 %v694_v17  ;;  %v316_v21 = vld [vmem:[%s1028_s3] sm:$0x1]  ;;  %s978_s8 = scalar_lea.hbm %s1031_s6, %s596_s20  ;;  %s820_s16 = smov [#allocation5]  }
  0x3b   : > { %s586_s14 = sshll.u32 %s292_s15, 3  ;;  %s300_s19 = scalar_lea.vmem %s1026_s1, %s292_s15  ;;  %607 = vmatprep.subr.bf16.mxu0 %v817_v0  ;;  %615 = vmatprep.subr.bf16.mxu1 %v817_v0  ;;  %v390_v22 = vsub.s32 0, %v389_v19  ;;  %v591_v40 = vld [vmem:[%s1030_s5] ss:$0 sm:$0xff] }
  0x3c   : > { %s297_s12 = scalar_lea.vmem %s1025_s0, %s586_s14  ;;  %v303_v2 = vld [vmem:[%s300_s19] sm:$0x1]  ;;  %s819_s15 = smov 96  }
  0x3d   : > { %v302_v1 = vld [vmem:[%s297_s12] sm:$0xff]  ;;  %v587_v3 = vmul.f32 -1.442695, %v303_v2  ;;  %s288_s14 = sand.u32 1, %s796_s22   ;;  %s734_s17 = sshll.u32 %s820_s16, 4  ;;  %s735_s17 = int_to_ptr.vmem [resolvable:$false] %s734_s17 }
  0x3e   : > { %v373_v4 = vsel %vm329_vm1, %v302_v1, 0.0  ;;  %608 = vmatpush3.bf16.msra.mxu0 %v693_v6  ;;  %616 = vmatpush3.bf16.msra.mxu1 %v695_v20  ;;  %s585_s18 = sshll.u32 %s288_s14, 3  ;;  %s472_s24 = scalar_lea.sflag [#allocation4], %s288_s14 }
  0x3f   : > { %374 = vadd.xlane.f32.xlu0 %v373_v4  ;;  %696 = vpow2.f32 %v587_v3  ;;  %s290_s27 = scalar_lea.vmem [#allocation5], %s585_s18 }
  0x40   : > { %s486_s12 = sshll.u32 %s290_s27, 4  ;;  %s980_s12 = int_to_ptr.vmem [resolvable:$true] %s486_s12 }
  0x41   : > { %s730_s13 = scalar_lea.vmem %s980_s12, 128  ;;  %p737_p1 = scmp.lt.s32.totalorder %s980_s12, %s735_s17 }
  0x42   : > { %p731_p8 = scmp.ne.s32.totalorder %s980_s12, %s730_s13 }
  0x44   : > { %p732_p11 = pnand %p731_p8, %p1043_p10 }
  0x46   : > { %p733_p13 = pneg %p732_p11 }
  0x49   : > { %v697_v7 = vpop.eup %696 }
  0x4a   : > { %v307_v8 = vadd.f32 1.0, %v697_v7 }
  0x4c   : > { %698 = vrcp.f32 %v307_v8 }
  0x56   : > { %v699_v9 = vpop.eup %698 }
  0x57   : > { %v310_v10 = vmul.f32 %v699_v9, %v303_v2 }
  0x59   : > { %v311_v11 = vpack.c.bf16 %v310_v10, %v310_v10 }
  0x5b   : > { %610 = vmatmul.mubr.msk.bf16.vlgmr.msra.gmra.mrb[0].mxu0 %vm329_vm1, %v311_v11 }
  0xcc   : > { %v375_v12 = vpop.xlane.xlu0 %374 }
  0xcd   : > { %v377_v13 = vmul.f32 0.03125, %v375_v12 }
  0xcf   : > { %v378_v14 = vsub.f32 %v302_v1, %v377_v13 }
  0xd1   : > { %v379_v15 = vmul.f32 %v378_v14, %v378_v14 }
  0xd3   : > { %v380_v16 = vsel %vm329_vm1, %v379_v15, 0.0 }
  0xd4   : > { %381 = vadd.xlane.f32.xlu0 %v380_v16 }
 0x12e   : > { %v367_v23 = vpop.f32.mrb[0].mxu0 }
 0x12f   : > { %v368_v24 = vadd.f32 %v367_v23, %v316_v21  ;;  %v611_v25 = vpop.f32.mrb[1].mxu0 }
 0x130   : > { %v370_v26 = vpop.f32.mrb[2].mxu0 }
 0x131   : > { %v387_v27 = vadd.f32 1.0, %v368_v24  ;;  %v400_v28 = vrot.slane %v368_v24, %v390_v22  ;;  %v612_v29 = vpop.f32.mrb[3].mxu0 }
 0x133   : > { %v391_v30 = vrot.slane %v387_v27, %v390_v22 }
 0x135   : > { %393 = vrot.lane.b32.xlu1 %v391_v30, %s819_s15  ;;  %s736_s15 = scalar_lea.vmem %s735_s17, 256 }
 0x136   : > { %p738_p3 = scmp.lt.s32.totalorder %s736_s15, %s730_s13 }
 0x138   : > { %p739_p5 = por %p738_p3, %p737_p1 }
 0x13a   : > { %p740_p6 = pnand %p739_p5, %p733_p13 }
 0x161   : > { %v382_v31 = vpop.xlane.xlu0 %381 }
 0x162   : > { %v383_v32 = vmul.f32 0.03125, %v382_v31 }
 0x164   : > { %v384_v33 = vadd.f32 1e-06, %v383_v32 }
 0x166   : > { %700 = vrsqrt.f32 %v384_v33 }
 0x170   : > { %v701_v34 = vpop.eup %700 }
 0x171   : > { %v386_v35 = vmul.f32 %v701_v34, %v378_v14 }
 0x1a7   : > { %v394_v36 = vpop.permute.xlu1 %393 }
 0x1a8   : > { %v396_v37 = vmul.f32 %v394_v36, %v386_v35 }
 0x1aa   : > { %v401_v38 = vadd.f32 %v400_v28, %v396_v37 }
 0x1ac   : > { %v402_v39 = vpack.c.bf16 %v401_v38, %v401_v38 }
 0x1ae   : > { %618 = vmatmul.mubr.msk.bf16.vlgmr.msra.gmra.mrb[0].mxu1 %vm329_vm1, %v402_v39 }
 0x281   : > { %v463_v41 = vpop.f32.mrb[0].mxu1 }
 0x282   : > { %v464_v42 = vadd.f32 %v591_v40, %v463_v41  ;;  %v619_v43 = vpop.f32.mrb[1].mxu1 }
 0x283   : > { %v466_v44 = vpop.f32.mrb[2].mxu1 }
 0x284   : > { %v620_v45 = vpop.f32.mrb[3].mxu1  ;;  %470 = vst.msk [vmem:[%s290_s27] sm:$0xff] %vm469_vm2, %v464_v42 }
 0x285   : > { %743 = shalt.err (!%p740_p6)
}
 0x286   : > { %s744_s14 = scalar_lea.hbm %s978_s8, 128  ;;  %s748_s19 = scalar_lea.hbm %s1031_s6, 256 }
 0x287   : > { %p745_p7 = scmp.ne.s32.totalorder %s978_s8, %s744_s14  ;;  %p749_p0 = scmp.lt.u32.totalorder %s978_s8, %s1031_s6 }
 0x288   : > { %p750_p2 = scmp.lt.u32.totalorder %s748_s19, %s744_s14  ;;  %p752_p8 = scmp.lt.u32.totalorder %s744_s14, %s978_s8 }
 0x289   : > { %p746_p9 = pnand %p745_p7, %p1043_p10 }
 0x28a   : > { %p751_p4 = por %p750_p2, %p749_p0 }
 0x28b   : > { %p747_p12 = pneg %p746_p9 }
 0x28c   : > { %p753_p11 = por %p752_p8, %p751_p4 }
 0x28e   : > { %p754_p13 = pnand %p753_p11, %p747_p12 }
 0x290   : > { %757 = shalt.err (!%p754_p13)
}
 0x291   : > { %625 = dma.vmem_to_hbm [thread:$0]  (%p1043_p10), %s980_s12, 128, %s978_s8, %s472_s24  }
 0x292 PF: > { %p637_p1 = scmp.ge.s32.totalorder %s812_s26, 2  ;;  %s498_s28 = sand.u32 1, %s792_s21  }
 0x293   : > { %p1044_p3 = scmp.ne.s32.totalorder %s1037_s9, 0  ;;  %s499_s30 = scalar_lea.sflag [#allocation4], %s498_s28 }
 0x295   : > { %p632_p5 = pnand %p637_p1, %p1044_p3 }
 0x297   : > { %787 = dma.done.wait (!%p632_p5), %s499_s30, 128  }
 0x298   : > { %789 = vsyncadd (!%p632_p5), %s499_s30, 4294967168  ;;  %s20_s26 = sadd.s32 1, %s812_s26   ;;  %s1045_s21 = smov %s796_s22 }
 0x299   : > { %p17_p6 = scmp.ge.s32.totalorder %s20_s26, 4   ;;  %s1046_s22 = smov %s800_s23 }
 0x29a   : > { %s1047_s23 = smov %s909_s10  ;;  %s1048_s24 = smov %s808_s25 }
 0x29b   : > { %s1049_s25 = smov %s1051_s29  ;;  %19 = sbr.rel (!%p17_p6) target bundleno = 5 (0x5), region = 87 }
 0x2a2   :  { %504 = vsyncpa [#allocation3], 1 }
 0x2a3   :  { %506 = vsyncpa [#allocation3 + $0x1], 1 }
 0x2a4   :  { %507 = vsyncpa [#allocation4], 1 }
 0x2a5   :  { %509 = vsyncpa [#allocation4 + $0x1], 1 }

</bundles_post_ra>
